<compile_context>
chip_gen: v6e
topology: v6e:2x2x1
jax: 0.10.0
libtpu: 0.0.40
codegen_flags: <defaults>
</compile_context>

<pallas_src>
import jax
import jax.numpy as jnp
from jax.experimental import pallas as pl
from jax.experimental.pallas import tpu as pltpu

LANE = 128


def _round_up(x, m):
    return ((x + m - 1) // m) * m


# --------------------------------------------------------------------------
# Kernel
# --------------------------------------------------------------------------
def actor_kernel(obs_ref, wt_ref, bt_ref, g_ref, be_ref,
                 w1_ref, b1_ref, w2_ref, b2_ref, w3_ref, b3_ref,
                 mu_ref, acc_ref):
    k = pl.program_id(1)

    # ---- trunk matmul: accumulate partial sums over the K (repr_dim) axis ----
    @pl.when(k == 0)
    def _init():
        acc_ref[...] = jnp.zeros_like(acc_ref)

    acc_ref[...] += jnp.dot(obs_ref[...].astype(jnp.bfloat16), wt_ref[...],
                            preferred_element_type=jnp.float32)

    # ---- finalize: LayerNorm -> Tanh -> policy MLP -> Tanh ----
    @pl.when(k == pl.num_programs(1) - 1)
    def _finalize():
        h = acc_ref[...] + bt_ref[...]
        mean = jnp.mean(h, axis=-1, keepdims=True)
        var = jnp.mean(h * h, axis=-1, keepdims=True) - mean * mean  # one-pass
        var = jnp.maximum(var, 0.0)                                  # NaN guard
        h = (h - mean) * jax.lax.rsqrt(var + 1e-5)
        h = jnp.tanh(h * g_ref[...] + be_ref[...])

        x = jnp.dot(h.astype(jnp.bfloat16), w1_ref[...],
                    preferred_element_type=jnp.float32) + b1_ref[...]
        x = jnp.maximum(x, 0.0)
        x = jnp.dot(x.astype(jnp.bfloat16), w2_ref[...],
                    preferred_element_type=jnp.float32) + b2_ref[...]
        x = jnp.maximum(x, 0.0)
        mu = jnp.dot(x.astype(jnp.bfloat16), w3_ref[...],
                     preferred_element_type=jnp.float32) + b3_ref[...]
        mu_ref[...] = jnp.tanh(mu)


# --------------------------------------------------------------------------
# One-time parameter preparation (done at parameter-update time, NOT per call)
# --------------------------------------------------------------------------
def prepare_params(params, k_tile_cap=512, k_single_max=2048):
    """bf16-cast and lane-pad weights once; returns (prepped, meta)."""
    wt, bt, gamma, beta, w1, b1, w2, b2, w3, b3 = params
    repr_dim, feature_dim = wt.shape
    hidden_dim = w1.shape[1]
    action_dim = w3.shape[1]

    h_pad = _round_up(hidden_dim, LANE)   # lane-dense MLP (exact: zeros + ReLU(0)=0)
    a_pad = _round_up(action_dim, LANE)   # lane-dense, unmasked output stores

    # K (repr_dim) tiling for the trunk matmul.
    if repr_dim <= k_single_max:
        tk, k_pad = repr_dim, repr_dim    # single K step, full-extent block
    else:
        tk = k_tile_cap
        k_pad = _round_up(repr_dim, tk)   # zero K-padding is exact

    def pad2(w, rows, cols, dtype):
        out = jnp.zeros((rows, cols), dtype)
        return out.at[:w.shape[0], :w.shape[1]].set(w.astype(dtype))

    prepped = (
        pad2(wt, k_pad, feature_dim, jnp.bfloat16),   # wt_b
        bt.astype(jnp.float32),
        gamma.astype(jnp.float32),
        beta.astype(jnp.float32),
        pad2(w1, feature_dim, h_pad, jnp.bfloat16),
        pad2(b1, 1, h_pad, jnp.float32),
        pad2(w2, h_pad, h_pad, jnp.bfloat16),
        pad2(b2, 1, h_pad, jnp.float32),
        pad2(w3, h_pad, a_pad, jnp.bfloat16),
        pad2(b3, 1, a_pad, jnp.float32),
    )
    meta = dict(repr_dim=repr_dim, k_pad=k_pad, tk=tk,
                feature_dim=feature_dim, hidden_pad=h_pad,
                action_dim=action_dim, a_pad=a_pad)
    return prepped, meta


# --------------------------------------------------------------------------
# Forward wrapper
# --------------------------------------------------------------------------
def actor_forward(obs, std, prepped, meta):
    """Returns (mu, std) — the parameters of the TruncatedNormal policy dist."""
    (wt_b, bt, gamma, beta, w1_b, b1p, w2_b, b2p, w3_b, b3p) = prepped
    B = obs.shape[0]
    F = meta["feature_dim"]
    Hp = meta["hidden_pad"]
    Ap = meta["a_pad"]
    Kp = meta["k_pad"]
    tk = meta["tk"]
    action_dim = meta["action_dim"]

    # obs stays f32; the kernel casts to bf16 (halves obs HBM traffic).
    obs = obs.astype(jnp.float32)
    if obs.shape[1] != Kp:                                # only if repr_dim % tk != 0
        obs = jnp.pad(obs, ((0, 0), (0, Kp - obs.shape[1])))

    # Batch tiling: >=16 rows (bf16 sublane pack), single step for tiny B,
    # up to 256 rows to fill the 256-wide MXU M-dim on v6e/v7x.
    tb = min(_round_up(B, 16), 256)
    b_pad = _round_up(B, tb)
    if b_pad != B:
        obs = jnp.pad(obs, ((0, b_pad - B), (0, 0)))

    grid = (b_pad // tb, Kp // tk)

    # ---- explicit VMEM budget (v5e 16 MiB scoped default, v7x 64 MiB/TC) ----
    resident_bytes = (3 * F * 4                              # bt, gamma, beta
                      + (F * Hp + Hp * Hp + Hp * Ap) * 2     # w1, w2, w3 (bf16)
                      + (2 * Hp + Ap) * 4)                   # b1, b2, b3
    pipelined_bytes = (2 * tb * tk * 4                       # obs tile (f32, 2-buf)
                       + 2 * tk * F * 2                      # trunk weight K-tile
                       + 2 * tb * Ap * 4)                    # output tile
    scratch_bytes = tb * F * 4                               # trunk accumulator
    vmem_need = 2 * resident_bytes + pipelined_bytes + scratch_bytes
    vmem_limit = int(min(max(2 * vmem_need, 32 * 2**20), 64 * 2**20))

    def build_call(use_buffered):
        def resident(shape):                 # constant block: same tile every step
            index_map = lambda i, k: (0,) * len(shape)
            if use_buffered and hasattr(pl, "Buffered"):
                try:
                    return pl.BlockSpec(shape, index_map,
                                        pipeline_mode=pl.Buffered(1))
                except TypeError:
                    pass
            return pl.BlockSpec(shape, index_map)

        grid_spec = pltpu.PrefetchScalarGridSpec(
            num_scalar_prefetch=0,
            grid=grid,
            in_specs=[
                pl.BlockSpec((tb, tk), lambda i, k: (i, k)),   # obs: batch+K tiled
                pl.BlockSpec((tk, F), lambda i, k: (k, 0)),    # trunk weight: K tiled
                resident(bt.shape), resident(gamma.shape), resident(beta.shape),
                resident(w1_b.shape), resident(b1p.shape),
                resident(w2_b.shape), resident(b2p.shape),
                resident(w3_b.shape), resident(b3p.shape),
            ],
            out_specs=pl.BlockSpec((tb, Ap), lambda i, k: (i, 0)),
            scratch_shapes=[pltpu.VMEM((tb, F), jnp.float32)],
        )
        return pl.pallas_call(
            actor_kernel,
            grid_spec=grid_spec,
            out_shape=jax.ShapeDtypeStruct((b_pad, Ap), jnp.float32),
            compiler_params=pltpu.CompilerParams(
                dimension_semantics=("parallel", "arbitrary"),
                vmem_limit_bytes=vmem_limit),
        )

    args = (obs, wt_b, bt, gamma, beta, w1_b, b1p, w2_b, b2p, w3_b, b3p)
    try:
        mu_padded = build_call(True)(*args)
    except Exception:
        # Fallback if this JAX build rejects single-buffered resident blocks.
        mu_padded = build_call(False)(*args)

    mu = mu_padded[:B, :action_dim]
    std_out = jnp.full((B, action_dim), std, jnp.float32)   # cheaper outside kernel
    return mu, std_out


# --------------------------------------------------------------------------
# Synthetic parameter init (shapes match nn.Linear / nn.LayerNorm)
# --------------------------------------------------------------------------
def init_params(key, repr_dim, action_dim, feature_dim, hidden_dim):
    ks = jax.random.split(key, 4)
    scale = 0.1

    def lin(k, fan_in, fan_out):
        w = scale * jax.random.normal(k, (fan_in, fan_out), jnp.float32)
        b = jnp.zeros((1, fan_out), jnp.float32)
        return w, b

    wt, bt = lin(ks[0], repr_dim, feature_dim)
    gamma = jnp.ones((1, feature_dim), jnp.float32)
    beta = jnp.zeros((1, feature_dim), jnp.float32)
    w1, b1 = lin(ks[1], feature_dim, hidden_dim)
    w2, b2 = lin(ks[2], hidden_dim, hidden_dim)
    w3, b3 = lin(ks[3], hidden_dim, action_dim)
    return (wt, bt, gamma, beta, w1, b1, w2, b2, w3, b3)


if __name__ == "__main__":
    key = jax.random.PRNGKey(0)
    B, repr_dim, feature_dim, hidden_dim, action_dim = 16, 128, 64, 64, 6

    k_obs, k_params = jax.random.split(key)
    obs = jax.random.normal(k_obs, (B, repr_dim), jnp.float32)
    params = init_params(k_params, repr_dim, action_dim, feature_dim, hidden_dim)
    prepped, meta = prepare_params(params)
    std = 0.2

    mu, std_out = actor_forward(obs, std, prepped, meta)
    jax.block_until_ready((mu, std_out))

    # ---- pure-JAX reference (same bf16 rounding of MXU operands) ----
    (wt, bt, gamma, beta, w1, b1, w2, b2, w3, b3) = params

    def r(x):  # emulate the in-kernel bf16 cast of matmul operands
        return x.astype(jnp.bfloat16).astype(jnp.float32)

    h = r(obs) @ r(wt) + bt
    m = h.mean(-1, keepdims=True)
    v = jnp.maximum((h * h).mean(-1, keepdims=True) - m * m, 0.0)
    h = jnp.tanh((h - m) * jax.lax.rsqrt(v + 1e-5) * gamma + beta)
    x = jnp.maximum(r(h) @ r(w1) + b1, 0.0)
    x = jnp.maximum(r(x) @ r(w2) + b2, 0.0)
    mu_ref = jnp.tanh(r(x) @ r(w3) + b3)

    assert mu.shape == (B, action_dim), "mu shape mismatch"
    assert jnp.allclose(mu, mu_ref, atol=2e-3), "mu mismatch"
    assert jnp.allclose(std_out, jnp.full((B, action_dim), std), atol=1e-7), "std mismatch"

    print("KERNEL_OK")
</pallas_src>

<mosaic_0001>
module attributes {stable_mosaic.version = 11 : i64} {
  func.func @actor_kernel(%arg0: i32, %arg1: i32, %arg2: memref<16x128xf32, #tpu.memory_space<vmem>>, %arg3: memref<128x64xbf16, #tpu.memory_space<vmem>>, %arg4: memref<1x64xf32, #tpu.memory_space<vmem>>, %arg5: memref<1x64xf32, #tpu.memory_space<vmem>>, %arg6: memref<1x64xf32, #tpu.memory_space<vmem>>, %arg7: memref<64x128xbf16, #tpu.memory_space<vmem>>, %arg8: memref<1x128xf32, #tpu.memory_space<vmem>>, %arg9: memref<128x128xbf16, #tpu.memory_space<vmem>>, %arg10: memref<1x128xf32, #tpu.memory_space<vmem>>, %arg11: memref<128x128xbf16, #tpu.memory_space<vmem>>, %arg12: memref<1x128xf32, #tpu.memory_space<vmem>>, %arg13: memref<16x128xf32, #tpu.memory_space<vmem>>, %arg14: memref<16x64xf32, #tpu.memory_space<vmem>>) attributes {dimension_semantics = [#tpu.dimension_semantics<parallel>, #tpu.dimension_semantics<arbitrary>], iteration_bounds = array<i64: 1, 1>, scalar_prefetch = 0 : i64, scratch_operands = 1 : i64, tpu.core_type = #tpu.core_type<tc>, window_params = [{transform_indices = @transform_0, window_bounds = array<i64: 16, 128>}, {transform_indices = @transform_1, window_bounds = array<i64: 128, 64>}, {pipeline_mode = #tpu.pipeline_mode<synchronous>, transform_indices = @transform_2, window_bounds = array<i64: 1, 64>}, {pipeline_mode = #tpu.pipeline_mode<synchronous>, transform_indices = @transform_3, window_bounds = array<i64: 1, 64>}, {pipeline_mode = #tpu.pipeline_mode<synchronous>, transform_indices = @transform_4, window_bounds = array<i64: 1, 64>}, {pipeline_mode = #tpu.pipeline_mode<synchronous>, transform_indices = @transform_5, window_bounds = array<i64: 64, 128>}, {pipeline_mode = #tpu.pipeline_mode<synchronous>, transform_indices = @transform_6, window_bounds = array<i64: 1, 128>}, {pipeline_mode = #tpu.pipeline_mode<synchronous>, transform_indices = @transform_7, window_bounds = array<i64: 128, 128>}, {pipeline_mode = #tpu.pipeline_mode<synchronous>, transform_indices = @transform_8, window_bounds = array<i64: 1, 128>}, {pipeline_mode = #tpu.pipeline_mode<synchronous>, transform_indices = @transform_9, window_bounds = array<i64: 128, 128>}, {pipeline_mode = #tpu.pipeline_mode<synchronous>, transform_indices = @transform_10, window_bounds = array<i64: 1, 128>}, {transform_indices = @transform_11, window_bounds = array<i64: 16, 128>}]} {
    %c0_i32 = arith.constant 0 : i32
    %0 = arith.cmpi eq, %arg1, %c0_i32 : i32
    %1 = arith.extui %0 : i1 to i32
    %c0_i32_0 = arith.constant 0 : i32
    %2 = arith.cmpi ne, %1, %c0_i32_0 : i32
    scf.if %2 {
      %cst_10 = arith.constant 0.000000e+00 : f32
      %13 = vector.broadcast %cst_10 : f32 to vector<16x64xf32>
      %c0_11 = arith.constant 0 : index
      %c0_12 = arith.constant 0 : index
      %14 = vector.load %arg14[%c0_11, %c0_12] : memref<16x64xf32, #tpu.memory_space<vmem>>, vector<16x64xf32>
      tpu.vector_store %arg14[%c0_11, %c0_12], %13 {strides = array<i32>} : memref<16x64xf32, #tpu.memory_space<vmem>>, vector<16x64xf32>,
    } else {
    }
    %c0 = arith.constant 0 : index
    %c0_1 = arith.constant 0 : index
    %3 = vector.load %arg14[%c0, %c0_1] : memref<16x64xf32, #tpu.memory_space<vmem>>, vector<16x64xf32>
    %c0_2 = arith.constant 0 : index
    %c0_3 = arith.constant 0 : index
    %4 = vector.load %arg2[%c0_2, %c0_3] : memref<16x128xf32, #tpu.memory_space<vmem>>, vector<16x128xf32>
    %5 = arith.truncf %4 : vector<16x128xf32> to vector<16x128xbf16>
    %c0_4 = arith.constant 0 : index
    %c0_5 = arith.constant 0 : index
    %6 = vector.load %arg3[%c0_4, %c0_5] : memref<128x64xbf16, #tpu.memory_space<vmem>>, vector<128x64xbf16>
    %cst = arith.constant dense<0.000000e+00> : vector<16x64xf32>
    %7 = tpu.matmul %5, %6, %cst {dimension_numbers = #tpu.dot_dimension_numbers<[1], [0], [0], [1], [0, 0, 1, 1], [], []>} : vector<16x128xbf16>, vector<128x64xbf16>, vector<16x64xf32> -> vector<16x64xf32>
    %8 = arith.addf %3, %7 : vector<16x64xf32>
    %c0_6 = arith.constant 0 : index
    %c0_7 = arith.constant 0 : index
    %9 = vector.load %arg14[%c0_6, %c0_7] : memref<16x64xf32, #tpu.memory_space<vmem>>, vector<16x64xf32>
    tpu.vector_store %arg14[%c0_6, %c0_7], %8 {strides = array<i32>} : memref<16x64xf32, #tpu.memory_space<vmem>>, vector<16x64xf32>,
    %c0_i32_8 = arith.constant 0 : i32
    %10 = arith.cmpi eq, %arg1, %c0_i32_8 : i32
    %11 = arith.extui %10 : i1 to i32
    %c0_i32_9 = arith.constant 0 : i32
    %12 = arith.cmpi ne, %11, %c0_i32_9 : i32
    scf.if %12 {
      %c0_10 = arith.constant 0 : index
      %c0_11 = arith.constant 0 : index
      %13 = vector.load %arg14[%c0_10, %c0_11] : memref<16x64xf32, #tpu.memory_space<vmem>>, vector<16x64xf32>
      %c0_12 = arith.constant 0 : index
      %c0_13 = arith.constant 0 : index
      %14 = vector.load %arg4[%c0_12, %c0_13] : memref<1x64xf32, #tpu.memory_space<vmem>>, vector<1x64xf32>
      %15 = vector.broadcast %14 : vector<1x64xf32> to vector<16x64xf32>
      %16 = arith.addf %13, %15 : vector<16x64xf32>
      %cst_14 = arith.constant dense<0.000000e+00> : vector<16xf32>
      %17 = vector.multi_reduction <add>, %16, %cst_14 [1] : vector<16x64xf32> to vector<16xf32>
      %18 = vector.shape_cast %17 : vector<16xf32> to vector<16x1xf32>
      %cst_15 = arith.constant 6.400000e+01 : f32
      %19 = vector.broadcast %cst_15 : f32 to vector<16x1xf32>
      %20 = arith.divf %18, %19 : vector<16x1xf32>
      %21 = arith.mulf %16, %16 : vector<16x64xf32>
      %cst_16 = arith.constant dense<0.000000e+00> : vector<16xf32>
      %22 = vector.multi_reduction <add>, %21, %cst_16 [1] : vector<16x64xf32> to vector<16xf32>
      %23 = vector.shape_cast %22 : vector<16xf32> to vector<16x1xf32>
      %cst_17 = arith.constant 6.400000e+01 : f32
      %24 = vector.broadcast %cst_17 : f32 to vector<16x1xf32>
      %25 = arith.divf %23, %24 : vector<16x1xf32>
      %26 = arith.mulf %20, %20 : vector<16x1xf32>
      %27 = arith.subf %25, %26 : vector<16x1xf32>
      %cst_18 = arith.constant 0.000000e+00 : f32
      %28 = vector.broadcast %cst_18 : f32 to vector<16x1xf32>
      %29 = arith.maximumf %27, %28 : vector<16x1xf32>
      %30 = vector.broadcast %20 : vector<16x1xf32> to vector<16x64xf32>
      %31 = arith.subf %16, %30 : vector<16x64xf32>
      %cst_19 = arith.constant 9.99999974E-6 : f32
      %32 = vector.broadcast %cst_19 : f32 to vector<16x1xf32>
      %33 = arith.addf %29, %32 : vector<16x1xf32>
      %34 = math.rsqrt %33 : vector<16x1xf32>
      %35 = vector.broadcast %34 : vector<16x1xf32> to vector<16x64xf32>
      %36 = arith.mulf %31, %35 : vector<16x64xf32>
      %c0_20 = arith.constant 0 : index
      %c0_21 = arith.constant 0 : index
      %37 = vector.load %arg5[%c0_20, %c0_21] : memref<1x64xf32, #tpu.memory_space<vmem>>, vector<1x64xf32>
      %38 = vector.broadcast %37 : vector<1x64xf32> to vector<16x64xf32>
      %39 = arith.mulf %36, %38 : vector<16x64xf32>
      %c0_22 = arith.constant 0 : index
      %c0_23 = arith.constant 0 : index
      %40 = vector.load %arg6[%c0_22, %c0_23] : memref<1x64xf32, #tpu.memory_space<vmem>>, vector<1x64xf32>
      %41 = vector.broadcast %40 : vector<1x64xf32> to vector<16x64xf32>
      %42 = arith.addf %39, %41 : vector<16x64xf32>
      %43 = math.tanh %42 : vector<16x64xf32>
      %44 = arith.truncf %43 : vector<16x64xf32> to vector<16x64xbf16>
      %c0_24 = arith.constant 0 : index
      %c0_25 = arith.constant 0 : index
      %45 = vector.load %arg7[%c0_24, %c0_25] : memref<64x128xbf16, #tpu.memory_space<vmem>>, vector<64x128xbf16>
      %cst_26 = arith.constant dense<0.000000e+00> : vector<16x128xf32>
      %46 = tpu.matmul %44, %45, %cst_26 {dimension_numbers = #tpu.dot_dimension_numbers<[1], [0], [0], [1], [0, 0, 1, 1], [], []>} : vector<16x64xbf16>, vector<64x128xbf16>, vector<16x128xf32> -> vector<16x128xf32>
      %c0_27 = arith.constant 0 : index
      %c0_28 = arith.constant 0 : index
      %47 = vector.load %arg8[%c0_27, %c0_28] : memref<1x128xf32, #tpu.memory_space<vmem>>, vector<1x128xf32>
      %48 = vector.broadcast %47 : vector<1x128xf32> to vector<16x128xf32>
      %49 = arith.addf %46, %48 : vector<16x128xf32>
      %cst_29 = arith.constant 0.000000e+00 : f32
      %50 = vector.broadcast %cst_29 : f32 to vector<16x128xf32>
      %51 = arith.maximumf %49, %50 : vector<16x128xf32>
      %52 = arith.truncf %51 : vector<16x128xf32> to vector<16x128xbf16>
      %c0_30 = arith.constant 0 : index
      %c0_31 = arith.constant 0 : index
      %53 = vector.load %arg9[%c0_30, %c0_31] : memref<128x128xbf16, #tpu.memory_space<vmem>>, vector<128x128xbf16>
      %cst_32 = arith.constant dense<0.000000e+00> : vector<16x128xf32>
      %54 = tpu.matmul %52, %53, %cst_32 {dimension_numbers = #tpu.dot_dimension_numbers<[1], [0], [0], [1], [0, 0, 1, 1], [], []>} : vector<16x128xbf16>, vector<128x128xbf16>, vector<16x128xf32> -> vector<16x128xf32>
      %c0_33 = arith.constant 0 : index
      %c0_34 = arith.constant 0 : index
      %55 = vector.load %arg10[%c0_33, %c0_34] : memref<1x128xf32, #tpu.memory_space<vmem>>, vector<1x128xf32>
      %56 = vector.broadcast %55 : vector<1x128xf32> to vector<16x128xf32>
      %57 = arith.addf %54, %56 : vector<16x128xf32>
      %cst_35 = arith.constant 0.000000e+00 : f32
      %58 = vector.broadcast %cst_35 : f32 to vector<16x128xf32>
      %59 = arith.maximumf %57, %58 : vector<16x128xf32>
      %60 = arith.truncf %59 : vector<16x128xf32> to vector<16x128xbf16>
      %c0_36 = arith.constant 0 : index
      %c0_37 = arith.constant 0 : index
      %61 = vector.load %arg11[%c0_36, %c0_37] : memref<128x128xbf16, #tpu.memory_space<vmem>>, vector<128x128xbf16>
      %cst_38 = arith.constant dense<0.000000e+00> : vector<16x128xf32>
      %62 = tpu.matmul %60, %61, %cst_38 {dimension_numbers = #tpu.dot_dimension_numbers<[1], [0], [0], [1], [0, 0, 1, 1], [], []>} : vector<16x128xbf16>, vector<128x128xbf16>, vector<16x128xf32> -> vector<16x128xf32>
      %c0_39 = arith.constant 0 : index
      %c0_40 = arith.constant 0 : index
      %63 = vector.load %arg12[%c0_39, %c0_40] : memref<1x128xf32, #tpu.memory_space<vmem>>, vector<1x128xf32>
      %64 = vector.broadcast %63 : vector<1x128xf32> to vector<16x128xf32>
      %65 = arith.addf %62, %64 : vector<16x128xf32>
      %66 = math.tanh %65 : vector<16x128xf32>
      %c0_41 = arith.constant 0 : index
      %c0_42 = arith.constant 0 : index
      %67 = vector.load %arg13[%c0_41, %c0_42] : memref<16x128xf32, #tpu.memory_space<vmem>>, vector<16x128xf32>
      tpu.vector_store %arg13[%c0_41, %c0_42], %66 {strides = array<i32>} : memref<16x128xf32, #tpu.memory_space<vmem>>, vector<16x128xf32>,
    } else {
    }
    return
  }
  func.func @transform_0(%arg0: i32, %arg1: i32) -> (i32, i32) {
    %c0_i32 = arith.constant 0 : i32
    return %arg0, %arg1 : i32, i32
  }
  func.func @transform_1(%arg0: i32, %arg1: i32) -> (i32, i32) {
    %c0_i32 = arith.constant 0 : i32
    %c0_i32_0 = arith.constant 0 : i32
    return %arg1, %c0_i32 : i32, i32
  }
  func.func @transform_2(%arg0: i32, %arg1: i32) -> (i32, i32) {
    %c0_i32 = arith.constant 0 : i32
    %c0_i32_0 = arith.constant 0 : i32
    %c0_i32_1 = arith.constant 0 : i32
    return %c0_i32, %c0_i32_0 : i32, i32
  }
  func.func @transform_3(%arg0: i32, %arg1: i32) -> (i32, i32) {
    %c0_i32 = arith.constant 0 : i32
    %c0_i32_0 = arith.constant 0 : i32
    %c0_i32_1 = arith.constant 0 : i32
    return %c0_i32, %c0_i32_0 : i32, i32
  }
  func.func @transform_4(%arg0: i32, %arg1: i32) -> (i32, i32) {
    %c0_i32 = arith.constant 0 : i32
    %c0_i32_0 = arith.constant 0 : i32
    %c0_i32_1 = arith.constant 0 : i32
    return %c0_i32, %c0_i32_0 : i32, i32
  }
  func.func @transform_5(%arg0: i32, %arg1: i32) -> (i32, i32) {
    %c0_i32 = arith.constant 0 : i32
    %c0_i32_0 = arith.constant 0 : i32
    %c0_i32_1 = arith.constant 0 : i32
    return %c0_i32, %c0_i32_0 : i32, i32
  }
  func.func @transform_6(%arg0: i32, %arg1: i32) -> (i32, i32) {
    %c0_i32 = arith.constant 0 : i32
    %c0_i32_0 = arith.constant 0 : i32
    %c0_i32_1 = arith.constant 0 : i32
    return %c0_i32, %c0_i32_0 : i32, i32
  }
  func.func @transform_7(%arg0: i32, %arg1: i32) -> (i32, i32) {
    %c0_i32 = arith.constant 0 : i32
    %c0_i32_0 = arith.constant 0 : i32
    %c0_i32_1 = arith.constant 0 : i32
    return %c0_i32, %c0_i32_0 : i32, i32
  }
  func.func @transform_8(%arg0: i32, %arg1: i32) -> (i32, i32) {
    %c0_i32 = arith.constant 0 : i32
    %c0_i32_0 = arith.constant 0 : i32
    %c0_i32_1 = arith.constant 0 : i32
    return %c0_i32, %c0_i32_0 : i32, i32
  }
  func.func @transform_9(%arg0: i32, %arg1: i32) -> (i32, i32) {
    %c0_i32 = arith.constant 0 : i32
    %c0_i32_0 = arith.constant 0 : i32
    %c0_i32_1 = arith.constant 0 : i32
    return %c0_i32, %c0_i32_0 : i32, i32
  }
  func.func @transform_10(%arg0: i32, %arg1: i32) -> (i32, i32) {
    %c0_i32 = arith.constant 0 : i32
    %c0_i32_0 = arith.constant 0 : i32
    %c0_i32_1 = arith.constant 0 : i32
    return %c0_i32, %c0_i32_0 : i32, i32
  }
  func.func @transform_11(%arg0: i32, %arg1: i32) -> (i32, i32) {
    %c0_i32 = arith.constant 0 : i32
    %c0_i32_0 = arith.constant 0 : i32
    return %arg0, %c0_i32 : i32, i32
  }
}

module attributes {stable_mosaic.version = 11 : i64} {
  func.func @actor_kernel(%arg0: i32, %arg1: i32, %arg2: memref<16x128xf32, #tpu.memory_space<vmem>>, %arg3: memref<128x64xbf16, #tpu.memory_space<vmem>>, %arg4: memref<1x64xf32, #tpu.memory_space<vmem>>, %arg5: memref<1x64xf32, #tpu.memory_space<vmem>>, %arg6: memref<1x64xf32, #tpu.memory_space<vmem>>, %arg7: memref<64x128xbf16, #tpu.memory_space<vmem>>, %arg8: memref<1x128xf32, #tpu.memory_space<vmem>>, %arg9: memref<128x128xbf16, #tpu.memory_space<vmem>>, %arg10: memref<1x128xf32, #tpu.memory_space<vmem>>, %arg11: memref<128x128xbf16, #tpu.memory_space<vmem>>, %arg12: memref<1x128xf32, #tpu.memory_space<vmem>>, %arg13: memref<16x128xf32, #tpu.memory_space<vmem>>, %arg14: memref<16x64xf32, #tpu.memory_space<vmem>>) attributes {dimension_semantics = [#tpu.dimension_semantics<parallel>, #tpu.dimension_semantics<arbitrary>], iteration_bounds = array<i64: 1, 1>, scalar_prefetch = 0 : i64, scratch_operands = 1 : i64, tpu.core_type = #tpu.core_type<tc>, window_params = [{transform_indices = @transform_0, window_bounds = array<i64: 16, 128>}, {transform_indices = @transform_1, window_bounds = array<i64: 128, 64>}, {pipeline_mode = #tpu.pipeline_mode<synchronous>, transform_indices = @transform_2, window_bounds = array<i64: 1, 64>}, {pipeline_mode = #tpu.pipeline_mode<synchronous>, transform_indices = @transform_3, window_bounds = array<i64: 1, 64>}, {pipeline_mode = #tpu.pipeline_mode<synchronous>, transform_indices = @transform_4, window_bounds = array<i64: 1, 64>}, {pipeline_mode = #tpu.pipeline_mode<synchronous>, transform_indices = @transform_5, window_bounds = array<i64: 64, 128>}, {pipeline_mode = #tpu.pipeline_mode<synchronous>, transform_indices = @transform_6, window_bounds = array<i64: 1, 128>}, {pipeline_mode = #tpu.pipeline_mode<synchronous>, transform_indices = @transform_7, window_bounds = array<i64: 128, 128>}, {pipeline_mode = #tpu.pipeline_mode<synchronous>, transform_indices = @transform_8, window_bounds = array<i64: 1, 128>}, {pipeline_mode = #tpu.pipeline_mode<synchronous>, transform_indices = @transform_9, window_bounds = array<i64: 128, 128>}, {pipeline_mode = #tpu.pipeline_mode<synchronous>, transform_indices = @transform_10, window_bounds = array<i64: 1, 128>}, {transform_indices = @transform_11, window_bounds = array<i64: 16, 128>}]} {
    %c0_i32 = arith.constant 0 : i32
    %0 = arith.cmpi eq, %arg1, %c0_i32 : i32
    %1 = arith.extui %0 : i1 to i32
    %c0_i32_0 = arith.constant 0 : i32
    %2 = arith.cmpi ne, %1, %c0_i32_0 : i32
    scf.if %2 {
      %cst_10 = arith.constant 0.000000e+00 : f32
      %13 = vector.broadcast %cst_10 : f32 to vector<16x64xf32>
      %c0_11 = arith.constant 0 : index
      %c0_12 = arith.constant 0 : index
      %14 = vector.load %arg14[%c0_11, %c0_12] : memref<16x64xf32, #tpu.memory_space<vmem>>, vector<16x64xf32>
      tpu.vector_store %arg14[%c0_11, %c0_12], %13 {strides = array<i32>} : memref<16x64xf32, #tpu.memory_space<vmem>>, vector<16x64xf32>,
    } else {
    }
    %c0 = arith.constant 0 : index
    %c0_1 = arith.constant 0 : index
    %3 = vector.load %arg14[%c0, %c0_1] : memref<16x64xf32, #tpu.memory_space<vmem>>, vector<16x64xf32>
    %c0_2 = arith.constant 0 : index
    %c0_3 = arith.constant 0 : index
    %4 = vector.load %arg2[%c0_2, %c0_3] : memref<16x128xf32, #tpu.memory_space<vmem>>, vector<16x128xf32>
    %5 = arith.truncf %4 : vector<16x128xf32> to vector<16x128xbf16>
    %c0_4 = arith.constant 0 : index
    %c0_5 = arith.constant 0 : index
    %6 = vector.load %arg3[%c0_4, %c0_5] : memref<128x64xbf16, #tpu.memory_space<vmem>>, vector<128x64xbf16>
    %cst = arith.constant dense<0.000000e+00> : vector<16x64xf32>
    %7 = tpu.matmul %5, %6, %cst {dimension_numbers = #tpu.dot_dimension_numbers<[1], [0], [0], [1], [0, 0, 1, 1], [], []>} : vector<16x128xbf16>, vector<128x64xbf16>, vector<16x64xf32> -> vector<16x64xf32>
    %8 = arith.addf %3, %7 : vector<16x64xf32>
    %c0_6 = arith.constant 0 : index
    %c0_7 = arith.constant 0 : index
    %9 = vector.load %arg14[%c0_6, %c0_7] : memref<16x64xf32, #tpu.memory_space<vmem>>, vector<16x64xf32>
    tpu.vector_store %arg14[%c0_6, %c0_7], %8 {strides = array<i32>} : memref<16x64xf32, #tpu.memory_space<vmem>>, vector<16x64xf32>,
    %c0_i32_8 = arith.constant 0 : i32
    %10 = arith.cmpi eq, %arg1, %c0_i32_8 : i32
    %11 = arith.extui %10 : i1 to i32
    %c0_i32_9 = arith.constant 0 : i32
    %12 = arith.cmpi ne, %11, %c0_i32_9 : i32
    scf.if %12 {
      %c0_10 = arith.constant 0 : index
      %c0_11 = arith.constant 0 : index
      %13 = vector.load %arg14[%c0_10, %c0_11] : memref<16x64xf32, #tpu.memory_space<vmem>>, vector<16x64xf32>
      %c0_12 = arith.constant 0 : index
      %c0_13 = arith.constant 0 : index
      %14 = vector.load %arg4[%c0_12, %c0_13] : memref<1x64xf32, #tpu.memory_space<vmem>>, vector<1x64xf32>
      %15 = vector.broadcast %14 : vector<1x64xf32> to vector<16x64xf32>
      %16 = arith.addf %13, %15 : vector<16x64xf32>
      %cst_14 = arith.constant dense<0.000000e+00> : vector<16xf32>
      %17 = vector.multi_reduction <add>, %16, %cst_14 [1] : vector<16x64xf32> to vector<16xf32>
      %18 = vector.shape_cast %17 : vector<16xf32> to vector<16x1xf32>
      %cst_15 = arith.constant 6.400000e+01 : f32
      %19 = vector.broadcast %cst_15 : f32 to vector<16x1xf32>
      %20 = arith.divf %18, %19 : vector<16x1xf32>
      %21 = arith.mulf %16, %16 : vector<16x64xf32>
      %cst_16 = arith.constant dense<0.000000e+00> : vector<16xf32>
      %22 = vector.multi_reduction <add>, %21, %cst_16 [1] : vector<16x64xf32> to vector<16xf32>
      %23 = vector.shape_cast %22 : vector<16xf32> to vector<16x1xf32>
      %cst_17 = arith.constant 6.400000e+01 : f32
      %24 = vector.broadcast %cst_17 : f32 to vector<16x1xf32>
      %25 = arith.divf %23, %24 : vector<16x1xf32>
      %26 = arith.mulf %20, %20 : vector<16x1xf32>
      %27 = arith.subf %25, %26 : vector<16x1xf32>
      %cst_18 = arith.constant 0.000000e+00 : f32
      %28 = vector.broadcast %cst_18 : f32 to vector<16x1xf32>
      %29 = arith.maximumf %27, %28 : vector<16x1xf32>
      %30 = vector.broadcast %20 : vector<16x1xf32> to vector<16x64xf32>
      %31 = arith.subf %16, %30 : vector<16x64xf32>
      %cst_19 = arith.constant 9.99999974E-6 : f32
      %32 = vector.broadcast %cst_19 : f32 to vector<16x1xf32>
      %33 = arith.addf %29, %32 : vector<16x1xf32>
      %34 = math.rsqrt %33 : vector<16x1xf32>
      %35 = vector.broadcast %34 : vector<16x1xf32> to vector<16x64xf32>
      %36 = arith.mulf %31, %35 : vector<16x64xf32>
      %c0_20 = arith.constant 0 : index
      %c0_21 = arith.constant 0 : index
      %37 = vector.load %arg5[%c0_20, %c0_21] : memref<1x64xf32, #tpu.memory_space<vmem>>, vector<1x64xf32>
      %38 = vector.broadcast %37 : vector<1x64xf32> to vector<16x64xf32>
      %39 = arith.mulf %36, %38 : vector<16x64xf32>
      %c0_22 = arith.constant 0 : index
      %c0_23 = arith.constant 0 : index
      %40 = vector.load %arg6[%c0_22, %c0_23] : memref<1x64xf32, #tpu.memory_space<vmem>>, vector<1x64xf32>
      %41 = vector.broadcast %40 : vector<1x64xf32> to vector<16x64xf32>
      %42 = arith.addf %39, %41 : vector<16x64xf32>
      %43 = math.tanh %42 : vector<16x64xf32>
      %44 = arith.truncf %43 : vector<16x64xf32> to vector<16x64xbf16>
      %c0_24 = arith.constant 0 : index
      %c0_25 = arith.constant 0 : index
      %45 = vector.load %arg7[%c0_24, %c0_25] : memref<64x128xbf16, #tpu.memory_space<vmem>>, vector<64x128xbf16>
      %cst_26 = arith.constant dense<0.000000e+00> : vector<16x128xf32>
      %46 = tpu.matmul %44, %45, %cst_26 {dimension_numbers = #tpu.dot_dimension_numbers<[1], [0], [0], [1], [0, 0, 1, 1], [], []>} : vector<16x64xbf16>, vector<64x128xbf16>, vector<16x128xf32> -> vector<16x128xf32>
      %c0_27 = arith.constant 0 : index
      %c0_28 = arith.constant 0 : index
      %47 = vector.load %arg8[%c0_27, %c0_28] : memref<1x128xf32, #tpu.memory_space<vmem>>, vector<1x128xf32>
      %48 = vector.broadcast %47 : vector<1x128xf32> to vector<16x128xf32>
      %49 = arith.addf %46, %48 : vector<16x128xf32>
      %cst_29 = arith.constant 0.000000e+00 : f32
      %50 = vector.broadcast %cst_29 : f32 to vector<16x128xf32>
      %51 = arith.maximumf %49, %50 : vector<16x128xf32>
      %52 = arith.truncf %51 : vector<16x128xf32> to vector<16x128xbf16>
      %c0_30 = arith.constant 0 : index
      %c0_31 = arith.constant 0 : index
      %53 = vector.load %arg9[%c0_30, %c0_31] : memref<128x128xbf16, #tpu.memory_space<vmem>>, vector<128x128xbf16>
      %cst_32 = arith.constant dense<0.000000e+00> : vector<16x128xf32>
      %54 = tpu.matmul %52, %53, %cst_32 {dimension_numbers = #tpu.dot_dimension_numbers<[1], [0], [0], [1], [0, 0, 1, 1], [], []>} : vector<16x128xbf16>, vector<128x128xbf16>, vector<16x128xf32> -> vector<16x128xf32>
      %c0_33 = arith.constant 0 : index
      %c0_34 = arith.constant 0 : index
      %55 = vector.load %arg10[%c0_33, %c0_34] : memref<1x128xf32, #tpu.memory_space<vmem>>, vector<1x128xf32>
      %56 = vector.broadcast %55 : vector<1x128xf32> to vector<16x128xf32>
      %57 = arith.addf %54, %56 : vector<16x128xf32>
      %cst_35 = arith.constant 0.000000e+00 : f32
      %58 = vector.broadcast %cst_35 : f32 to vector<16x128xf32>
      %59 = arith.maximumf %57, %58 : vector<16x128xf32>
      %60 = arith.truncf %59 : vector<16x128xf32> to vector<16x128xbf16>
      %c0_36 = arith.constant 0 : index
      %c0_37 = arith.constant 0 : index
      %61 = vector.load %arg11[%c0_36, %c0_37] : memref<128x128xbf16, #tpu.memory_space<vmem>>, vector<128x128xbf16>
      %cst_38 = arith.constant dense<0.000000e+00> : vector<16x128xf32>
      %62 = tpu.matmul %60, %61, %cst_38 {dimension_numbers = #tpu.dot_dimension_numbers<[1], [0], [0], [1], [0, 0, 1, 1], [], []>} : vector<16x128xbf16>, vector<128x128xbf16>, vector<16x128xf32> -> vector<16x128xf32>
      %c0_39 = arith.constant 0 : index
      %c0_40 = arith.constant 0 : index
      %63 = vector.load %arg12[%c0_39, %c0_40] : memref<1x128xf32, #tpu.memory_space<vmem>>, vector<1x128xf32>
      %64 = vector.broadcast %63 : vector<1x128xf32> to vector<16x128xf32>
      %65 = arith.addf %62, %64 : vector<16x128xf32>
      %66 = math.tanh %65 : vector<16x128xf32>
      %c0_41 = arith.constant 0 : index
      %c0_42 = arith.constant 0 : index
      %67 = vector.load %arg13[%c0_41, %c0_42] : memref<16x128xf32, #tpu.memory_space<vmem>>, vector<16x128xf32>
      tpu.vector_store %arg13[%c0_41, %c0_42], %66 {strides = array<i32>} : memref<16x128xf32, #tpu.memory_space<vmem>>, vector<16x128xf32>,
    } else {
    }
    return
  }
  func.func @transform_0(%arg0: i32, %arg1: i32) -> (i32, i32) {
    %c0_i32 = arith.constant 0 : i32
    return %arg0, %arg1 : i32, i32
  }
  func.func @transform_1(%arg0: i32, %arg1: i32) -> (i32, i32) {
    %c0_i32 = arith.constant 0 : i32
    %c0_i32_0 = arith.constant 0 : i32
    return %arg1, %c0_i32 : i32, i32
  }
  func.func @transform_2(%arg0: i32, %arg1: i32) -> (i32, i32) {
    %c0_i32 = arith.constant 0 : i32
    %c0_i32_0 = arith.constant 0 : i32
    %c0_i32_1 = arith.constant 0 : i32
    return %c0_i32, %c0_i32_0 : i32, i32
  }
  func.func @transform_3(%arg0: i32, %arg1: i32) -> (i32, i32) {
    %c0_i32 = arith.constant 0 : i32
    %c0_i32_0 = arith.constant 0 : i32
    %c0_i32_1 = arith.constant 0 : i32
    return %c0_i32, %c0_i32_0 : i32, i32
  }
  func.func @transform_4(%arg0: i32, %arg1: i32) -> (i32, i32) {
    %c0_i32 = arith.constant 0 : i32
    %c0_i32_0 = arith.constant 0 : i32
    %c0_i32_1 = arith.constant 0 : i32
    return %c0_i32, %c0_i32_0 : i32, i32
  }
  func.func @transform_5(%arg0: i32, %arg1: i32) -> (i32, i32) {
    %c0_i32 = arith.constant 0 : i32
    %c0_i32_0 = arith.constant 0 : i32
    %c0_i32_1 = arith.constant 0 : i32
    return %c0_i32, %c0_i32_0 : i32, i32
  }
  func.func @transform_6(%arg0: i32, %arg1: i32) -> (i32, i32) {
    %c0_i32 = arith.constant 0 : i32
    %c0_i32_0 = arith.constant 0 : i32
    %c0_i32_1 = arith.constant 0 : i32
    return %c0_i32, %c0_i32_0 : i32, i32
  }
  func.func @transform_7(%arg0: i32, %arg1: i32) -> (i32, i32) {
    %c0_i32 = arith.constant 0 : i32
    %c0_i32_0 = arith.constant 0 : i32
    %c0_i32_1 = arith.constant 0 : i32
    return %c0_i32, %c0_i32_0 : i32, i32
  }
  func.func @transform_8(%arg0: i32, %arg1: i32) -> (i32, i32) {
    %c0_i32 = arith.constant 0 : i32
    %c0_i32_0 = arith.constant 0 : i32
    %c0_i32_1 = arith.constant 0 : i32
    return %c0_i32, %c0_i32_0 : i32, i32
  }
  func.func @transform_9(%arg0: i32, %arg1: i32) -> (i32, i32) {
    %c0_i32 = arith.constant 0 : i32
    %c0_i32_0 = arith.constant 0 : i32
    %c0_i32_1 = arith.constant 0 : i32
    return %c0_i32, %c0_i32_0 : i32, i32
  }
  func.func @transform_10(%arg0: i32, %arg1: i32) -> (i32, i32) {
    %c0_i32 = arith.constant 0 : i32
    %c0_i32_0 = arith.constant 0 : i32
    %c0_i32_1 = arith.constant 0 : i32
    return %c0_i32, %c0_i32_0 : i32, i32
  }
  func.func @transform_11(%arg0: i32, %arg1: i32) -> (i32, i32) {
    %c0_i32 = arith.constant 0 : i32
    %c0_i32_0 = arith.constant 0 : i32
    return %arg0, %c0_i32 : i32, i32
  }
}

</mosaic_0001>

<bundles_post_ra>
// kernel: tpu_custom_call.1
= control target key start
LH: loop header
LB: loop body
LE: loop exit
PB: predicated region body
PF: predicated region fallthrough
CT: control target
= control target key end

     0   :  { %16 = vsyncpa [#allocation4], 0  ;;  %s1056_s0 = inlined_call_operand.hbm [shape: f32[16,128], index: 0, kind: input, shape index: {}]   ;;  %s1057_s1 = inlined_call_operand.vmem [shape: bf16[128,64], index: 1, kind: input, shape index: {}]   ;;  %s1058_s2 = inlined_call_operand.vmem [shape: f32[1,64], index: 2, kind: input, shape index: {}]   ;;  %s1059_s3 = inlined_call_operand.vmem [shape: f32[1,64], index: 3, kind: input, shape index: {}]   ;;  %s1060_s4 = inlined_call_operand.vmem [shape: f32[1,64], index: 4, kind: input, shape index: {}]   ;;  %s1061_s5 = inlined_call_operand.vmem [shape: bf16[64,128], index: 5, kind: input, shape index: {}]   ;;  %s1062_s6 = inlined_call_operand.vmem [shape: f32[1,128], index: 6, kind: input, shape index: {}]   ;;  %s1063_s7 = inlined_call_operand.vmem [shape: bf16[128,128], index: 7, kind: input, shape index: {}]   ;;  %s1064_s8 = inlined_call_operand.vmem [shape: f32[1,128], index: 8, kind: input, shape index: {}]   ;;  %s1065_s9 = inlined_call_operand.hbm [shape: bf16[128,128], index: 9, kind: input, shape index: {}]   ;;  %s1066_s10 = inlined_call_operand.vmem [shape: f32[1,128], index: 10, kind: input, shape index: {}]   ;;  %s1067_s11 = inlined_call_operand.hbm [shape: f32[16,128], index: 11, kind: output, shape index: {}]  }
   0x1   :  { %17 = vsyncpa [#allocation7], 0 }
   0x2   :  { %18 = vsyncpa [#allocation5], 0  ;;  %s847_s17 = smov [#allocation3]  }
   0x3   :  { %s24_s18 = sshll.u32 %s847_s17, 4  ;;  %s25_s18 = int_to_ptr.vmem [resolvable:$true] %s24_s18 }
   0x4   :  { %s789_s19 = scalar_lea.vmem %s25_s18, 256  ;;  %p794_p1 = scmp.lt.s32.totalorder %s25_s18, %s25_s18 }
   0x5   :  { %p790_p0 = scmp.ne.s32.totalorder %s25_s18, %s789_s19  ;;  %p795_p2 = scmp.lt.s32.totalorder %s789_s19, %s789_s19 }
   0x7   :  { %p796_p3 = por %p795_p2, %p794_p1 }
   0x9   :  { %p797_p4 = pnand %p796_p3, %p790_p0 }
   0xb   :  { %800 = shalt.err (!%p797_p4)
}
   0xc   :  { %s848_s20 = smov 128   ;;  %s849_s21 = smov 8  }
   0xd   :  { %30 = dma.hbm_to_vmem [thread:$0]  %s1056_s0, 256, %s25_s18, [#allocation4], %s848_s20, %s848_s20, %s849_s21  }
   0xe   :  { %s850_s24 = smov [#allocation6]  }
   0xf   :  { %s52_s25 = sshll.u32 %s850_s24, 4  ;;  %s53_s25 = int_to_ptr.vmem [resolvable:$true] %s52_s25 }
  0x10   :  { %s809_s26 = scalar_lea.vmem %s53_s25, 1024  ;;  %p814_p6 = scmp.lt.s32.totalorder %s53_s25, %s53_s25 }
  0x11   :  { %p810_p5 = scmp.ne.s32.totalorder %s53_s25, %s809_s26  ;;  %p815_p7 = scmp.lt.s32.totalorder %s809_s26, %s809_s26 }
  0x13   :  { %p816_p8 = por %p815_p7, %p814_p6 }
  0x15   :  { %p817_p9 = pnand %p816_p8, %p810_p5 }
  0x17   :  { %820 = shalt.err (!%p817_p9)
}
  0x18   :  { %s851_s27 = smov 64   ;;  %s852_s28 = smov 4  }
  0x19   :  { %58 = dma.hbm_to_vmem [thread:$0]  %s1065_s9, 1024, %s53_s25, [#allocation7], %s851_s27, %s851_s27, %s852_s28  }
  0x1a   :  { %841 = dma.done.wait [#allocation4], 256  }
  0x1b   :  { %842 = vsyncadd [#allocation4], 4294967040 }
  0x1c   :  { %843 = dma.done.wait [#allocation7], 1024  }
  0x1d   :  { %844 = vsyncadd [#allocation7], 4294966272  ;;  %vm72_vm0 = vcmask 523264   ;;  %v853_v0 = vmov 0.0   ;;  %vm854_vm1 = vmmov 0   ;;  %v741_v1 = vld [vmem:[%s1057_s1 + $0x38] sm:$0xff]  }
  0x1e   :  { %660 = vmatprep.subr.bf16.mxu0 %v853_v0  ;;  %676 = vmatprep.mubr.msk.bf16.mxu0 %vm854_vm1, %v853_v0  ;;  %73 = vst.msk [vmem:[#allocation2] sm:$0xff] %vm72_vm0, %v853_v0  ;;  %74 = vst.msk [vmem:[#allocation2 + $0x8] sm:$0xff] %vm72_vm0, %v853_v0  ;;  %v742_v2 = vld [vmem:[%s1057_s1 + $0x30] sm:$0xff]   ;;  %v743_v3 = vld [vmem:[%s1057_s1 + $0x28] sm:$0xff]  }
  0x1f   :  { %680 = vmatprep.subr.bf16.mxu1 %v853_v0  ;;  %688 = vmatprep.mubr.msk.bf16.mxu1 %vm854_vm1, %v853_v0  ;;  %v744_v4 = vld [vmem:[%s1057_s1 + $0x20] sm:$0xff]   ;;  %v745_v5 = vld [vmem:[%s1057_s1 + $0x18] sm:$0xff]   ;;  %v746_v6 = vld [vmem:[%s1057_s1 + $0x10] sm:$0xff]  }
  0x20   :  { %661 = vmatpush3.bf16.msra.mxu0 %v741_v1  ;;  %v747_v7 = vld [vmem:[%s1057_s1 + $0x8] sm:$0xff]   ;;  %v748_v8 = vld [vmem:[%s1057_s1] sm:$0xff]   ;;  %v77_v9 = vld [vmem:[#allocation3] sm:$0xff] }
  0x21   :  { %662 = vmatprep.subr.bf16.mxu0 %v853_v0  ;;  %v78_v10 = vld [vmem:[#allocation3 + $0x8] sm:$0xff]  ;;  %v601_v20 = vld [vmem:[%s1058_s2] ss:$0 sm:$0xff]  ;;  %v750_v32 = vld [vmem:[%s1061_s5 + $0x10] sm:$0xff]  }
  0x22   :  { %v79_v11 = vpack.c.bf16 %v78_v10, %v77_v9  ;;  %v749_v31 = vld [vmem:[%s1061_s5 + $0x18] sm:$0xff]   ;;  %v751_v33 = vld [vmem:[%s1061_s5 + $0x8] sm:$0xff]   ;;  %v752_v34 = vld [vmem:[%s1061_s5] sm:$0xff]  }
  0x23   :  { %681 = vmatpush3.bf16.msra.mxu1 %v749_v31  ;;  %v602_v53 = vld [vmem:[%s1059_s3] ss:$0 sm:$0xff]  ;;  %v759_v9 = vld [vmem:[%s1063_s7 + $0x8] sm:$0xff]  }
  0x24   :  { %663 = vmatpush3.bf16.msra.mxu0 %v742_v2  ;;  %682 = vmatprep.subr.bf16.mxu1 %v853_v0  ;;  %v603_v57 = vld [vmem:[%s1060_s4] ss:$0 sm:$0xff]  ;;  %v753_v2 = vld [vmem:[%s1063_s7 + $0x38] sm:$0xff]  }
  0x25   :  { %664 = vmatprep.subr.bf16.mxu0 %v853_v0  ;;  %v75_v12 = vld [vmem:[#allocation2] sm:$0xff]  ;;  %v76_v16 = vld [vmem:[#allocation2 + $0x8] sm:$0xff] }
  0x26   :  { %v760_v10 = vld [vmem:[%s1063_s7] sm:$0xff]  }
  0x27   :  { %683 = vmatpush3.bf16.msra.mxu1 %v750_v32 }
  0x28   :  { %665 = vmatpush3.bf16.msra.mxu0 %v743_v3  ;;  %684 = vmatprep.subr.bf16.mxu1 %v853_v0 }
  0x29   :  { %666 = vmatprep.subr.bf16.mxu0 %v853_v0 }
  0x2b   :  { %685 = vmatpush3.bf16.msra.mxu1 %v751_v33 }
  0x2c   :  { %667 = vmatpush3.bf16.msra.mxu0 %v744_v4  ;;  %686 = vmatprep.subr.bf16.mxu1 %v853_v0  ;;  %v754_v4 = vld [vmem:[%s1063_s7 + $0x30] sm:$0xff]  }
  0x2d   :  { %668 = vmatprep.subr.bf16.mxu0 %v853_v0 }
  0x2f   :  { %687 = vmatpush3.bf16.msra.mxu1 %v752_v34 }
  0x30   :  { %669 = vmatpush3.bf16.msra.mxu0 %v745_v5  ;;  %692 = vmatprep.subr.bf16.mxu1 %v853_v0  ;;  %v755_v5 = vld [vmem:[%s1063_s7 + $0x28] sm:$0xff]  }
  0x31   :  { %670 = vmatprep.subr.bf16.mxu0 %v853_v0 }
  0x34   :  { %671 = vmatpush3.bf16.msra.mxu0 %v746_v6  ;;  %v756_v6 = vld [vmem:[%s1063_s7 + $0x20] sm:$0xff]  }
  0x35   :  { %672 = vmatprep.subr.bf16.mxu0 %v853_v0 }
  0x38   :  { %673 = vmatpush3.bf16.msra.mxu0 %v747_v7  ;;  %v757_v7 = vld [vmem:[%s1063_s7 + $0x18] sm:$0xff]  }
  0x39   :  { %674 = vmatprep.subr.bf16.mxu0 %v853_v0 }
  0x3c   :  { %675 = vmatpush3.bf16.msra.mxu0 %v748_v8  ;;  %v758_v8 = vld [vmem:[%s1063_s7 + $0x10] sm:$0xff]  }
  0x3d   :  { %712 = vmatprep.subr.bf16.mxu0 %v853_v0 }
  0x3f   :  { %677 = vmatmul.mubr.bf16.vlgmr.msra.gmra.mxu0 %v79_v11  ;;  %v761_v11 = vld [vmem:[#allocation6 + $0x38] sm:$0xff]  }
  0x40   :  { %728 = vmatprep.mubr.msk.bf16.mxu0 %vm854_vm1, %v853_v0  ;;  %713 = vmatpush3.bf16.msra.mxu0 %v761_v11 }
  0x41   :  { %714 = vmatprep.subr.bf16.mxu0 %v853_v0 }
  0xff   :  { %v178_v13 = vpop.f32.mrf.mxu0 }
 0x100   :  { %v185_v14 = vadd.f32 %v178_v13, %v75_v12  ;;  %v762_v12 = vld [vmem:[#allocation6 + $0x30] sm:$0xff]   ;;  %v763_v13 = vld [vmem:[#allocation6 + $0x28] sm:$0xff]  }
 0x101   :  { %v678_v15 = vpop.f32.mrf.mxu0  ;;  %715 = vmatpush3.bf16.msra.mxu0 %v762_v12 }
 0x102   :  { %188 = vst.msk [vmem:[#allocation2] sm:$0xff] %vm72_vm0, %v185_v14  ;;  %716 = vmatprep.subr.bf16.mxu0 %v853_v0  ;;  %v764_v14 = vld [vmem:[#allocation6 + $0x20] sm:$0xff]   ;;  %v765_v15 = vld [vmem:[#allocation6 + $0x18] sm:$0xff]  }
 0x103   :  { %v181_v17 = vpop.f32.mrf.mxu0 }
 0x104   :  { %v186_v18 = vadd.f32 %v181_v17, %v76_v16  ;;  %v604_v16 = vld [vmem:[%s1062_s6] ss:$0 sm:$0xff] }
 0x105   :  { %v679_v19 = vpop.f32.mrf.mxu0  ;;  %717 = vmatpush3.bf16.msra.mxu0 %v763_v13 }
 0x106   :  { %189 = vst.msk [vmem:[#allocation2 + $0x8] sm:$0xff] %vm72_vm0, %v186_v18  ;;  %718 = vmatprep.subr.bf16.mxu0 %v853_v0 }
 0x109   :  { %v193_v21 = vld [vmem:[#allocation2] sm:$0xff]  ;;  %719 = vmatpush3.bf16.msra.mxu0 %v764_v14 }
 0x10a   :  { %v202_v22 = vadd.f32 %v601_v20, %v193_v21  ;;  %720 = vmatprep.subr.bf16.mxu0 %v853_v0 }
 0x10c   :  { %v204_v23 = vsel %vm72_vm0, %v202_v22, 0.0  ;;  %v213_v24 = vmul.f32 %v202_v22, %v202_v22 }
 0x10d   :  { %205 = vadd.xlane.f32.xlu0 %v204_v23  ;;  %v194_v25 = vld [vmem:[#allocation2 + $0x8] sm:$0xff]  ;;  %721 = vmatpush3.bf16.msra.mxu0 %v765_v15 }
 0x10e   :  { %v215_v26 = vsel %vm72_vm0, %v213_v24, 0.0  ;;  %v203_v27 = vadd.f32 %v601_v20, %v194_v25  ;;  %722 = vmatprep.subr.bf16.mxu0 %v853_v0 }
 0x10f   :  { %216 = vadd.xlane.f32.xlu1 %v215_v26  ;;  %v766_v26 = vld [vmem:[#allocation6 + $0x10] sm:$0xff]  }
 0x110   :  { %v207_v28 = vsel %vm72_vm0, %v203_v27, 0.0  ;;  %v214_v29 = vmul.f32 %v203_v27, %v203_v27 }
 0x111   :  { %208 = vadd.xlane.f32.xlu0 %v207_v28  ;;  %723 = vmatpush3.bf16.msra.mxu0 %v766_v26  ;;  %v768_v28 = vld [vmem:[#allocation6] sm:$0xff]  }
 0x112   :  { %v218_v30 = vsel %vm72_vm0, %v214_v29, 0.0  ;;  %724 = vmatprep.subr.bf16.mxu0 %v853_v0  ;;  %v610_v29 = vld [vmem:[%s1064_s8] ss:$0 sm:$0xff]  ;;  %s855_s8 = smov [#allocation8]  }
 0x113   :  { %219 = vadd.xlane.f32.xlu1 %v218_v30  ;;  %s580_s5 = sshll.u32 %s855_s8, 4  ;;  %s581_s5 = int_to_ptr.vmem [resolvable:$true] %s580_s5 }
 0x114   :  { %s821_s15 = scalar_lea.vmem %s581_s5, 256  ;;  %p826_p11 = scmp.lt.s32.totalorder %s581_s5, %s581_s5 }
 0x115   :  { %p822_p10 = scmp.ne.s32.totalorder %s581_s5, %s821_s15  ;;  %p827_p12 = scmp.lt.s32.totalorder %s821_s15, %s821_s15 }
 0x117   :  { %p828_p13 = por %p827_p12, %p826_p11 }
 0x119   :  { %p829_p0 = pnand %p828_p13, %p822_p10 }
 0x196   :  { %v206_v35 = vpop.xlane.xlu0 %205 }
 0x197   :  { %v211_v36 = vmul.f32 0.015625, %v206_v35 }
 0x198   :  { %v217_v37 = vpop.xlane.xlu1 %216 }
 0x199   :  { %v223_v38 = vmul.f32 %v211_v36, %v211_v36  ;;  %v221_v39 = vmul.f32 0.015625, %v217_v37  ;;  %v229_v51 = vsub.f32 %v202_v22, %v211_v36 }
 0x19a   :  { %v209_v40 = vpop.xlane.xlu0 %208 }
 0x19b   :  { %v225_v41 = vsub.f32 %v221_v39, %v223_v38  ;;  %v212_v42 = vmul.f32 0.015625, %v209_v40 }
 0x19c   :  { %v220_v43 = vpop.xlane.xlu1 %219 }
 0x19d   :  { %v227_v44 = vmax.f32 %v225_v41, 0.0  ;;  %v224_v45 = vmul.f32 %v212_v42, %v212_v42  ;;  %v222_v46 = vmul.f32 0.015625, %v220_v43  ;;  %v230_v56 = vsub.f32 %v203_v27, %v212_v42  ;;  %v767_v27 = vld [vmem:[#allocation6 + $0x8] sm:$0xff]  }
 0x19e   :  { %725 = vmatpush3.bf16.msra.mxu0 %v767_v27 }
 0x19f   :  { %v231_v47 = vadd.f32 1e-05, %v227_v44  ;;  %v226_v48 = vsub.f32 %v222_v46, %v224_v45  ;;  %726 = vmatprep.subr.bf16.mxu0 %v853_v0 }
 0x1a1   :  { %769 = vrsqrt.f32 %v231_v47  ;;  %v228_v49 = vmax.f32 %v226_v48, 0.0 }
 0x1a2   :  { %727 = vmatpush3.bf16.msra.mxu0 %v768_v28 }
 0x1a3   :  { %v232_v50 = vadd.f32 1e-05, %v228_v49 }
 0x1a5   :  { %771 = vrsqrt.f32 %v232_v50 }
 0x1ae   :  { %v770_v52 = vpop.eup %769 }
 0x1af   :  { %v235_v54 = vmul.f32 %v770_v52, %v229_v51 }
 0x1b1   :  { %v244_v55 = vmul.f32 %v602_v53, %v235_v54 }
 0x1b2   :  { %v772_v58 = vpop.eup %771 }
 0x1b3   :  { %v236_v59 = vmul.f32 %v772_v58, %v230_v56  ;;  %v253_v60 = vadd.f32 %v603_v57, %v244_v55 }
 0x1b5   :  { %v245_v61 = vmul.f32 %v602_v53, %v236_v59  ;;  %773 = vtanh.f32 %v253_v60 }
 0x1b7   :  { %v254_v62 = vadd.f32 %v603_v57, %v245_v61 }
 0x1b9   :  { %775 = vtanh.f32 %v254_v62 }
 0x1c2   :  { %v774_v63 = vpop.eup %773 }
 0x1c6   :  { %v776_v1 = vpop.eup %775 }
 0x1c7   :  { %v257_v3 = vpack.c.bf16 %v776_v1, %v774_v63 }
 0x1c9   :  { %689 = vmatmul.mubr.msk.bf16.vlgmr.msra.gmra.mxu1 %vm72_vm0, %v257_v3 }
 0x1ca   :  { %693 = vmatpush3.bf16.msra.mxu1 %v753_v2  ;;  %708 = vmatprep.mubr.msk.bf16.mxu1 %vm854_vm1, %v853_v0 }
 0x1cb   :  { %694 = vmatprep.subr.bf16.mxu1 %v853_v0 }
 0x1ce   :  { %695 = vmatpush3.bf16.msra.mxu1 %v754_v4 }
 0x1cf   :  { %696 = vmatprep.subr.bf16.mxu1 %v853_v0 }
 0x1d2   :  { %697 = vmatpush3.bf16.msra.mxu1 %v755_v5 }
 0x1d3   :  { %698 = vmatprep.subr.bf16.mxu1 %v853_v0 }
 0x1d6   :  { %699 = vmatpush3.bf16.msra.mxu1 %v756_v6 }
 0x1d7   :  { %700 = vmatprep.subr.bf16.mxu1 %v853_v0 }
 0x1da   :  { %701 = vmatpush3.bf16.msra.mxu1 %v757_v7 }
 0x1db   :  { %702 = vmatprep.subr.bf16.mxu1 %v853_v0 }
 0x1de   :  { %703 = vmatpush3.bf16.msra.mxu1 %v758_v8 }
 0x1df   :  { %704 = vmatprep.subr.bf16.mxu1 %v853_v0 }
 0x1e2   :  { %705 = vmatpush3.bf16.msra.mxu1 %v759_v9 }
 0x1e3   :  { %706 = vmatprep.subr.bf16.mxu1 %v853_v0  ;;  %v619_v0 = vld [vmem:[%s1066_s10] ss:$0 sm:$0xff] }
 0x1e6   :  { %707 = vmatpush3.bf16.msra.mxu1 %v760_v10 }
 0x289   :  { %v334_v17 = vpop.f32.mrf.mxu1 }
 0x28a   :  { %v335_v19 = vadd.f32 %v604_v16, %v334_v17 }
 0x28b   :  { %v690_v18 = vpop.f32.mrf.mxu1 }
 0x28c   :  { %v341_v23 = vmax.f32 %v335_v19, 0.0 }
 0x28d   :  { %v337_v20 = vpop.f32.mrf.mxu1 }
 0x28e   :  { %v338_v21 = vadd.f32 %v604_v16, %v337_v20 }
 0x28f   :  { %v691_v22 = vpop.f32.mrf.mxu1 }
 0x290   :  { %v342_v24 = vmax.f32 %v338_v21, 0.0 }
 0x292   :  { %v343_v25 = vpack.c.bf16 %v342_v24, %v341_v23 }
 0x294   :  { %709 = vmatmul.mubr.bf16.vlgmr.msra.gmra.mxu1 %v343_v25 }
 0x354   :  { %v449_v30 = vpop.f32.mrf.mxu1 }
 0x355   :  { %v450_v32 = vadd.f32 %v610_v29, %v449_v30 }
 0x356   :  { %v710_v31 = vpop.f32.mrf.mxu1 }
 0x357   :  { %v456_v36 = vmax.f32 %v450_v32, 0.0 }
 0x358   :  { %v452_v33 = vpop.f32.mrf.mxu1 }
 0x359   :  { %v453_v34 = vadd.f32 %v610_v29, %v452_v33 }
 0x35a   :  { %v711_v35 = vpop.f32.mrf.mxu1 }
 0x35b   :  { %v457_v37 = vmax.f32 %v453_v34, 0.0 }
 0x35d   :  { %v458_v38 = vpack.c.bf16 %v457_v37, %v456_v36 }
 0x35f   :  { %729 = vmatmul.mubr.bf16.vlgmr.msra.gmra.mxu0 %v458_v38 }
 0x41f   :  { %v564_v39 = vpop.f32.mrf.mxu0 }
 0x420   :  { %v565_v40 = vadd.f32 %v619_v0, %v564_v39 }
 0x421   :  { %v730_v41 = vpop.f32.mrf.mxu0 }
 0x422   :  { %777 = vtanh.f32 %v565_v40 }
 0x423   :  { %v567_v42 = vpop.f32.mrf.mxu0 }
 0x424   :  { %v568_v43 = vadd.f32 %v619_v0, %v567_v42 }
 0x425   :  { %v731_v44 = vpop.f32.mrf.mxu0 }
 0x426   :  { %779 = vtanh.f32 %v568_v43 }
 0x42f   :  { %v778_v45 = vpop.eup %777 }
 0x430   :  { %573 = vst [vmem:[#allocation8] sm:$0xff] %v778_v45 }
 0x433   :  { %v780_v46 = vpop.eup %779 }
 0x434   :  { %574 = vst [vmem:[#allocation8 + $0x8] sm:$0xff] %v780_v46 }
 0x435   :  { %832 = shalt.err (!%p829_p0)
}
 0x436   :  { %586 = dma.vmem_to_hbm [thread:$0]  %s581_s5, 256, %s1067_s11, [#allocation5], %s848_s20, %s848_s20, %s849_s21  }
 0x437   :  { %845 = dma.done.wait [#allocation5], 256  }
 0x438   :  { %846 = vsyncadd [#allocation5], 4294967040 }
 0x439   :  { %590 = vsyncpa [#allocation4], 1 }
 0x43a   :  { %591 = vsyncpa [#allocation7], 1 }
 0x43b   :  { %592 = vsyncpa [#allocation5], 1 }

// kernel: tpu_custom_call.1
= control target key start
LH: loop header
LB: loop body
LE: loop exit
PB: predicated region body
PF: predicated region fallthrough
CT: control target
= control target key end

     0   :  { %16 = vsyncpa [#allocation4], 0  ;;  %s1056_s0 = inlined_call_operand.hbm [shape: f32[16,128], index: 0, kind: input, shape index: {}]   ;;  %s1057_s1 = inlined_call_operand.vmem [shape: bf16[128,64], index: 1, kind: input, shape index: {}]   ;;  %s1058_s2 = inlined_call_operand.vmem [shape: f32[1,64], index: 2, kind: input, shape index: {}]   ;;  %s1059_s3 = inlined_call_operand.vmem [shape: f32[1,64], index: 3, kind: input, shape index: {}]   ;;  %s1060_s4 = inlined_call_operand.vmem [shape: f32[1,64], index: 4, kind: input, shape index: {}]   ;;  %s1061_s5 = inlined_call_operand.vmem [shape: bf16[64,128], index: 5, kind: input, shape index: {}]   ;;  %s1062_s6 = inlined_call_operand.vmem [shape: f32[1,128], index: 6, kind: input, shape index: {}]   ;;  %s1063_s7 = inlined_call_operand.vmem [shape: bf16[128,128], index: 7, kind: input, shape index: {}]   ;;  %s1064_s8 = inlined_call_operand.vmem [shape: f32[1,128], index: 8, kind: input, shape index: {}]   ;;  %s1065_s9 = inlined_call_operand.hbm [shape: bf16[128,128], index: 9, kind: input, shape index: {}]   ;;  %s1066_s10 = inlined_call_operand.vmem [shape: f32[1,128], index: 10, kind: input, shape index: {}]   ;;  %s1067_s11 = inlined_call_operand.hbm [shape: f32[16,128], index: 11, kind: output, shape index: {}]  }
   0x1   :  { %17 = vsyncpa [#allocation7], 0 }
   0x2   :  { %18 = vsyncpa [#allocation5], 0  ;;  %s847_s17 = smov [#allocation3]  }
   0x3   :  { %s24_s18 = sshll.u32 %s847_s17, 4  ;;  %s25_s18 = int_to_ptr.vmem [resolvable:$true] %s24_s18 }
   0x4   :  { %s789_s19 = scalar_lea.vmem %s25_s18, 256  ;;  %p794_p1 = scmp.lt.s32.totalorder %s25_s18, %s25_s18 }
   0x5   :  { %p790_p0 = scmp.ne.s32.totalorder %s25_s18, %s789_s19  ;;  %p795_p2 = scmp.lt.s32.totalorder %s789_s19, %s789_s19 }
   0x7   :  { %p796_p3 = por %p795_p2, %p794_p1 }
   0x9   :  { %p797_p4 = pnand %p796_p3, %p790_p0 }
   0xb   :  { %800 = shalt.err (!%p797_p4)
}
   0xc   :  { %s848_s20 = smov 128   ;;  %s849_s21 = smov 8  }
   0xd   :  { %30 = dma.hbm_to_vmem [thread:$0]  %s1056_s0, 256, %s25_s18, [#allocation4], %s848_s20, %s848_s20, %s849_s21  }
   0xe   :  { %s850_s24 = smov [#allocation6]  }
   0xf   :  { %s52_s25 = sshll.u32 %s850_s24, 4  ;;  %s53_s25 = int_to_ptr.vmem [resolvable:$true] %s52_s25 }
  0x10   :  { %s809_s26 = scalar_lea.vmem %s53_s25, 1024  ;;  %p814_p6 = scmp.lt.s32.totalorder %s53_s25, %s53_s25 }
  0x11   :  { %p810_p5 = scmp.ne.s32.totalorder %s53_s25, %s809_s26  ;;  %p815_p7 = scmp.lt.s32.totalorder %s809_s26, %s809_s26 }
  0x13   :  { %p816_p8 = por %p815_p7, %p814_p6 }
  0x15   :  { %p817_p9 = pnand %p816_p8, %p810_p5 }
  0x17   :  { %820 = shalt.err (!%p817_p9)
}
  0x18   :  { %s851_s27 = smov 64   ;;  %s852_s28 = smov 4  }
  0x19   :  { %58 = dma.hbm_to_vmem [thread:$0]  %s1065_s9, 1024, %s53_s25, [#allocation7], %s851_s27, %s851_s27, %s852_s28  }
  0x1a   :  { %841 = dma.done.wait [#allocation4], 256  }
  0x1b   :  { %842 = vsyncadd [#allocation4], 4294967040 }
  0x1c   :  { %843 = dma.done.wait [#allocation7], 1024  }
  0x1d   :  { %844 = vsyncadd [#allocation7], 4294966272  ;;  %vm72_vm0 = vcmask 523264   ;;  %v853_v0 = vmov 0.0   ;;  %vm854_vm1 = vmmov 0   ;;  %v741_v1 = vld [vmem:[%s1057_s1 + $0x38] sm:$0xff]  }
  0x1e   :  { %660 = vmatprep.subr.bf16.mxu0 %v853_v0  ;;  %676 = vmatprep.mubr.msk.bf16.mxu0 %vm854_vm1, %v853_v0  ;;  %73 = vst.msk [vmem:[#allocation2] sm:$0xff] %vm72_vm0, %v853_v0  ;;  %74 = vst.msk [vmem:[#allocation2 + $0x8] sm:$0xff] %vm72_vm0, %v853_v0  ;;  %v742_v2 = vld [vmem:[%s1057_s1 + $0x30] sm:$0xff]   ;;  %v743_v3 = vld [vmem:[%s1057_s1 + $0x28] sm:$0xff]  }
  0x1f   :  { %680 = vmatprep.subr.bf16.mxu1 %v853_v0  ;;  %688 = vmatprep.mubr.msk.bf16.mxu1 %vm854_vm1, %v853_v0  ;;  %v744_v4 = vld [vmem:[%s1057_s1 + $0x20] sm:$0xff]   ;;  %v745_v5 = vld [vmem:[%s1057_s1 + $0x18] sm:$0xff]   ;;  %v746_v6 = vld [vmem:[%s1057_s1 + $0x10] sm:$0xff]  }
  0x20   :  { %661 = vmatpush3.bf16.msra.mxu0 %v741_v1  ;;  %v747_v7 = vld [vmem:[%s1057_s1 + $0x8] sm:$0xff]   ;;  %v748_v8 = vld [vmem:[%s1057_s1] sm:$0xff]   ;;  %v77_v9 = vld [vmem:[#allocation3] sm:$0xff] }
  0x21   :  { %662 = vmatprep.subr.bf16.mxu0 %v853_v0  ;;  %v78_v10 = vld [vmem:[#allocation3 + $0x8] sm:$0xff]  ;;  %v601_v20 = vld [vmem:[%s1058_s2] ss:$0 sm:$0xff]  ;;  %v750_v32 = vld [vmem:[%s1061_s5 + $0x10] sm:$0xff]  }
  0x22   :  { %v79_v11 = vpack.c.bf16 %v78_v10, %v77_v9  ;;  %v749_v31 = vld [vmem:[%s1061_s5 + $0x18] sm:$0xff]   ;;  %v751_v33 = vld [vmem:[%s1061_s5 + $0x8] sm:$0xff]   ;;  %v752_v34 = vld [vmem:[%s1061_s5] sm:$0xff]  }
  0x23   :  { %681 = vmatpush3.bf16.msra.mxu1 %v749_v31  ;;  %v602_v53 = vld [vmem:[%s1059_s3] ss:$0 sm:$0xff]  ;;  %v759_v9 = vld [vmem:[%s1063_s7 + $0x8] sm:$0xff]  }
  0x24   :  { %663 = vmatpush3.bf16.msra.mxu0 %v742_v2  ;;  %682 = vmatprep.subr.bf16.mxu1 %v853_v0  ;;  %v603_v57 = vld [vmem:[%s1060_s4] ss:$0 sm:$0xff]  ;;  %v753_v2 = vld [vmem:[%s1063_s7 + $0x38] sm:$0xff]  }
  0x25   :  { %664 = vmatprep.subr.bf16.mxu0 %v853_v0  ;;  %v75_v12 = vld [vmem:[#allocation2] sm:$0xff]  ;;  %v76_v16 = vld [vmem:[#allocation2 + $0x8] sm:$0xff] }
  0x26   :  { %v760_v10 = vld [vmem:[%s1063_s7] sm:$0xff]  }
  0x27   :  { %683 = vmatpush3.bf16.msra.mxu1 %v750_v32 }
  0x28   :  { %665 = vmatpush3.bf16.msra.mxu0 %v743_v3  ;;  %684 = vmatprep.subr.bf16.mxu1 %v853_v0 }
  0x29   :  { %666 = vmatprep.subr.bf16.mxu0 %v853_v0 }
  0x2b   :  { %685 = vmatpush3.bf16.msra.mxu1 %v751_v33 }
  0x2c   :  { %667 = vmatpush3.bf16.msra.mxu0 %v744_v4  ;;  %686 = vmatprep.subr.bf16.mxu1 %v853_v0  ;;  %v754_v4 = vld [vmem:[%s1063_s7 + $0x30] sm:$0xff]  }
  0x2d   :  { %668 = vmatprep.subr.bf16.mxu0 %v853_v0 }
  0x2f   :  { %687 = vmatpush3.bf16.msra.mxu1 %v752_v34 }
  0x30   :  { %669 = vmatpush3.bf16.msra.mxu0 %v745_v5  ;;  %692 = vmatprep.subr.bf16.mxu1 %v853_v0  ;;  %v755_v5 = vld [vmem:[%s1063_s7 + $0x28] sm:$0xff]  }
  0x31   :  { %670 = vmatprep.subr.bf16.mxu0 %v853_v0 }
  0x34   :  { %671 = vmatpush3.bf16.msra.mxu0 %v746_v6  ;;  %v756_v6 = vld [vmem:[%s1063_s7 + $0x20] sm:$0xff]  }
  0x35   :  { %672 = vmatprep.subr.bf16.mxu0 %v853_v0 }
  0x38   :  { %673 = vmatpush3.bf16.msra.mxu0 %v747_v7  ;;  %v757_v7 = vld [vmem:[%s1063_s7 + $0x18] sm:$0xff]  }
  0x39   :  { %674 = vmatprep.subr.bf16.mxu0 %v853_v0 }
  0x3c   :  { %675 = vmatpush3.bf16.msra.mxu0 %v748_v8  ;;  %v758_v8 = vld [vmem:[%s1063_s7 + $0x10] sm:$0xff]  }
  0x3d   :  { %712 = vmatprep.subr.bf16.mxu0 %v853_v0 }
  0x3f   :  { %677 = vmatmul.mubr.bf16.vlgmr.msra.gmra.mxu0 %v79_v11  ;;  %v761_v11 = vld [vmem:[#allocation6 + $0x38] sm:$0xff]  }
  0x40   :  { %728 = vmatprep.mubr.msk.bf16.mxu0 %vm854_vm1, %v853_v0  ;;  %713 = vmatpush3.bf16.msra.mxu0 %v761_v11 }
  0x41   :  { %714 = vmatprep.subr.bf16.mxu0 %v853_v0 }
  0xff   :  { %v178_v13 = vpop.f32.mrf.mxu0 }
 0x100   :  { %v185_v14 = vadd.f32 %v178_v13, %v75_v12  ;;  %v762_v12 = vld [vmem:[#allocation6 + $0x30] sm:$0xff]   ;;  %v763_v13 = vld [vmem:[#allocation6 + $0x28] sm:$0xff]  }
 0x101   :  { %v678_v15 = vpop.f32.mrf.mxu0  ;;  %715 = vmatpush3.bf16.msra.mxu0 %v762_v12 }
 0x102   :  { %188 = vst.msk [vmem:[#allocation2] sm:$0xff] %vm72_vm0, %v185_v14  ;;  %716 = vmatprep.subr.bf16.mxu0 %v853_v0  ;;  %v764_v14 = vld [vmem:[#allocation6 + $0x20] sm:$0xff]   ;;  %v765_v15 = vld [vmem:[#allocation6 + $0x18] sm:$0xff]  }
 0x103   :  { %v181_v17 = vpop.f32.mrf.mxu0 }
 0x104   :  { %v186_v18 = vadd.f32 %v181_v17, %v76_v16  ;;  %v604_v16 = vld [vmem:[%s1062_s6] ss:$0 sm:$0xff] }
 0x105   :  { %v679_v19 = vpop.f32.mrf.mxu0  ;;  %717 = vmatpush3.bf16.msra.mxu0 %v763_v13 }
 0x106   :  { %189 = vst.msk [vmem:[#allocation2 + $0x8] sm:$0xff] %vm72_vm0, %v186_v18  ;;  %718 = vmatprep.subr.bf16.mxu0 %v853_v0 }
 0x109   :  { %v193_v21 = vld [vmem:[#allocation2] sm:$0xff]  ;;  %719 = vmatpush3.bf16.msra.mxu0 %v764_v14 }
 0x10a   :  { %v202_v22 = vadd.f32 %v601_v20, %v193_v21  ;;  %720 = vmatprep.subr.bf16.mxu0 %v853_v0 }
 0x10c   :  { %v204_v23 = vsel %vm72_vm0, %v202_v22, 0.0  ;;  %v213_v24 = vmul.f32 %v202_v22, %v202_v22 }
 0x10d   :  { %205 = vadd.xlane.f32.xlu0 %v204_v23  ;;  %v194_v25 = vld [vmem:[#allocation2 + $0x8] sm:$0xff]  ;;  %721 = vmatpush3.bf16.msra.mxu0 %v765_v15 }
 0x10e   :  { %v215_v26 = vsel %vm72_vm0, %v213_v24, 0.0  ;;  %v203_v27 = vadd.f32 %v601_v20, %v194_v25  ;;  %722 = vmatprep.subr.bf16.mxu0 %v853_v0 }
 0x10f   :  { %216 = vadd.xlane.f32.xlu1 %v215_v26  ;;  %v766_v26 = vld [vmem:[#allocation6 + $0x10] sm:$0xff]  }
 0x110   :  { %v207_v28 = vsel %vm72_vm0, %v203_v27, 0.0  ;;  %v214_v29 = vmul.f32 %v203_v27, %v203_v27 }
 0x111   :  { %208 = vadd.xlane.f32.xlu0 %v207_v28  ;;  %723 = vmatpush3.bf16.msra.mxu0 %v766_v26  ;;  %v768_v28 = vld [vmem:[#allocation6] sm:$0xff]  }
 0x112   :  { %v218_v30 = vsel %vm72_vm0, %v214_v29, 0.0  ;;  %724 = vmatprep.subr.bf16.mxu0 %v853_v0  ;;  %v610_v29 = vld [vmem:[%s1064_s8] ss:$0 sm:$0xff]  ;;  %s855_s8 = smov [#allocation8]  }
 0x113   :  { %219 = vadd.xlane.f32.xlu1 %v218_v30  ;;  %s580_s5 = sshll.u32 %s855_s8, 4  ;;  %s581_s5 = int_to_ptr.vmem [resolvable:$true] %s580_s5 }
 0x114   :  { %s821_s15 = scalar_lea.vmem %s581_s5, 256  ;;  %p826_p11 = scmp.lt.s32.totalorder %s581_s5, %s581_s5 }
 0x115   :  { %p822_p10 = scmp.ne.s32.totalorder %s581_s5, %s821_s15  ;;  %p827_p12 = scmp.lt.s32.totalorder %s821_s15, %s821_s15 }
 0x117   :  { %p828_p13 = por %p827_p12, %p826_p11 }
 0x119   :  { %p829_p0 = pnand %p828_p13, %p822_p10 }
 0x196   :  { %v206_v35 = vpop.xlane.xlu0 %205 }
 0x197   :  { %v211_v36 = vmul.f32 0.015625, %v206_v35 }
 0x198   :  { %v217_v37 = vpop.xlane.xlu1 %216 }
 0x199   :  { %v223_v38 = vmul.f32 %v211_v36, %v211_v36  ;;  %v221_v39 = vmul.f32 0.015625, %v217_v37  ;;  %v229_v51 = vsub.f32 %v202_v22, %v211_v36 }
 0x19a   :  { %v209_v40 = vpop.xlane.xlu0 %208 }
 0x19b   :  { %v225_v41 = vsub.f32 %v221_v39, %v223_v38  ;;  %v212_v42 = vmul.f32 0.015625, %v209_v40 }
 0x19c   :  { %v220_v43 = vpop.xlane.xlu1 %219 }
 0x19d   :  { %v227_v44 = vmax.f32 %v225_v41, 0.0  ;;  %v224_v45 = vmul.f32 %v212_v42, %v212_v42  ;;  %v222_v46 = vmul.f32 0.015625, %v220_v43  ;;  %v230_v56 = vsub.f32 %v203_v27, %v212_v42  ;;  %v767_v27 = vld [vmem:[#allocation6 + $0x8] sm:$0xff]  }
 0x19e   :  { %725 = vmatpush3.bf16.msra.mxu0 %v767_v27 }
 0x19f   :  { %v231_v47 = vadd.f32 1e-05, %v227_v44  ;;  %v226_v48 = vsub.f32 %v222_v46, %v224_v45  ;;  %726 = vmatprep.subr.bf16.mxu0 %v853_v0 }
 0x1a1   :  { %769 = vrsqrt.f32 %v231_v47  ;;  %v228_v49 = vmax.f32 %v226_v48, 0.0 }
 0x1a2   :  { %727 = vmatpush3.bf16.msra.mxu0 %v768_v28 }
 0x1a3   :  { %v232_v50 = vadd.f32 1e-05, %v228_v49 }
 0x1a5   :  { %771 = vrsqrt.f32 %v232_v50 }
 0x1ae   :  { %v770_v52 = vpop.eup %769 }
 0x1af   :  { %v235_v54 = vmul.f32 %v770_v52, %v229_v51 }
 0x1b1   :  { %v244_v55 = vmul.f32 %v602_v53, %v235_v54 }
 0x1b2   :  { %v772_v58 = vpop.eup %771 }
 0x1b3   :  { %v236_v59 = vmul.f32 %v772_v58, %v230_v56  ;;  %v253_v60 = vadd.f32 %v603_v57, %v244_v55 }
 0x1b5   :  { %v245_v61 = vmul.f32 %v602_v53, %v236_v59  ;;  %773 = vtanh.f32 %v253_v60 }
 0x1b7   :  { %v254_v62 = vadd.f32 %v603_v57, %v245_v61 }
 0x1b9   :  { %775 = vtanh.f32 %v254_v62 }
 0x1c2   :  { %v774_v63 = vpop.eup %773 }
 0x1c6   :  { %v776_v1 = vpop.eup %775 }
 0x1c7   :  { %v257_v3 = vpack.c.bf16 %v776_v1, %v774_v63 }
 0x1c9   :  { %689 = vmatmul.mubr.msk.bf16.vlgmr.msra.gmra.mxu1 %vm72_vm0, %v257_v3 }
 0x1ca   :  { %693 = vmatpush3.bf16.msra.mxu1 %v753_v2  ;;  %708 = vmatprep.mubr.msk.bf16.mxu1 %vm854_vm1, %v853_v0 }
 0x1cb   :  { %694 = vmatprep.subr.bf16.mxu1 %v853_v0 }
 0x1ce   :  { %695 = vmatpush3.bf16.msra.mxu1 %v754_v4 }
 0x1cf   :  { %696 = vmatprep.subr.bf16.mxu1 %v853_v0 }
 0x1d2   :  { %697 = vmatpush3.bf16.msra.mxu1 %v755_v5 }
 0x1d3   :  { %698 = vmatprep.subr.bf16.mxu1 %v853_v0 }
 0x1d6   :  { %699 = vmatpush3.bf16.msra.mxu1 %v756_v6 }
 0x1d7   :  { %700 = vmatprep.subr.bf16.mxu1 %v853_v0 }
 0x1da   :  { %701 = vmatpush3.bf16.msra.mxu1 %v757_v7 }
 0x1db   :  { %702 = vmatprep.subr.bf16.mxu1 %v853_v0 }
 0x1de   :  { %703 = vmatpush3.bf16.msra.mxu1 %v758_v8 }
 0x1df   :  { %704 = vmatprep.subr.bf16.mxu1 %v853_v0 }
 0x1e2   :  { %705 = vmatpush3.bf16.msra.mxu1 %v759_v9 }
 0x1e3   :  { %706 = vmatprep.subr.bf16.mxu1 %v853_v0  ;;  %v619_v0 = vld [vmem:[%s1066_s10] ss:$0 sm:$0xff] }
 0x1e6   :  { %707 = vmatpush3.bf16.msra.mxu1 %v760_v10 }
 0x289   :  { %v334_v17 = vpop.f32.mrf.mxu1 }
 0x28a   :  { %v335_v19 = vadd.f32 %v604_v16, %v334_v17 }
 0x28b   :  { %v690_v18 = vpop.f32.mrf.mxu1 }
 0x28c   :  { %v341_v23 = vmax.f32 %v335_v19, 0.0 }
 0x28d   :  { %v337_v20 = vpop.f32.mrf.mxu1 }
 0x28e   :  { %v338_v21 = vadd.f32 %v604_v16, %v337_v20 }
 0x28f   :  { %v691_v22 = vpop.f32.mrf.mxu1 }
 0x290   :  { %v342_v24 = vmax.f32 %v338_v21, 0.0 }
 0x292   :  { %v343_v25 = vpack.c.bf16 %v342_v24, %v341_v23 }
 0x294   :  { %709 = vmatmul.mubr.bf16.vlgmr.msra.gmra.mxu1 %v343_v25 }
 0x354   :  { %v449_v30 = vpop.f32.mrf.mxu1 }
 0x355   :  { %v450_v32 = vadd.f32 %v610_v29, %v449_v30 }
 0x356   :  { %v710_v31 = vpop.f32.mrf.mxu1 }
 0x357   :  { %v456_v36 = vmax.f32 %v450_v32, 0.0 }
 0x358   :  { %v452_v33 = vpop.f32.mrf.mxu1 }
 0x359   :  { %v453_v34 = vadd.f32 %v610_v29, %v452_v33 }
 0x35a   :  { %v711_v35 = vpop.f32.mrf.mxu1 }
 0x35b   :  { %v457_v37 = vmax.f32 %v453_v34, 0.0 }
 0x35d   :  { %v458_v38 = vpack.c.bf16 %v457_v37, %v456_v36 }
 0x35f   :  { %729 = vmatmul.mubr.bf16.vlgmr.msra.gmra.mxu0 %v458_v38 }
 0x41f   :  { %v564_v39 = vpop.f32.mrf.mxu0 }
 0x420   :  { %v565_v40 = vadd.f32 %v619_v0, %v564_v39 }
 0x421   :  { %v730_v41 = vpop.f32.mrf.mxu0 }
 0x422   :  { %777 = vtanh.f32 %v565_v40 }
 0x423   :  { %v567_v42 = vpop.f32.mrf.mxu0 }
 0x424   :  { %v568_v43 = vadd.f32 %v619_v0, %v567_v42 }
 0x425   :  { %v731_v44 = vpop.f32.mrf.mxu0 }
 0x426   :  { %779 = vtanh.f32 %v568_v43 }
 0x42f   :  { %v778_v45 = vpop.eup %777 }
 0x430   :  { %573 = vst [vmem:[#allocation8] sm:$0xff] %v778_v45 }
 0x433   :  { %v780_v46 = vpop.eup %779 }
 0x434   :  { %574 = vst [vmem:[#allocation8 + $0x8] sm:$0xff] %v780_v46 }
 0x435   :  { %832 = shalt.err (!%p829_p0)
}
 0x436   :  { %586 = dma.vmem_to_hbm [thread:$0]  %s581_s5, 256, %s1067_s11, [#allocation5], %s848_s20, %s848_s20, %s849_s21  }
 0x437   :  { %845 = dma.done.wait [#allocation5], 256  }
 0x438   :  { %846 = vsyncadd [#allocation5], 4294967040 }
 0x439   :  { %590 = vsyncpa [#allocation4], 1 }
 0x43a   :  { %591 = vsyncpa [#allocation7], 1 }
 0x43b   :  { %592 = vsyncpa [#allocation5], 1 }

</bundles_post_ra>
